<compile_context>
chip_gen: v6e
topology: v6e:2x2x1
jax: 0.10.0
libtpu: 0.0.40
codegen_flags: <defaults>
</compile_context>

<pallas_src>
import functools
import math

import jax
import jax.numpy as jnp
from jax.experimental import pallas as pl
from jax.experimental.pallas import tpu as pltpu

_VMEM_LIMIT_BYTES = 32 * 1024 * 1024  # conservative: fits v5e/v6e (128 MiB) and v7x (64 MiB)


# --------------------------------------------------------------------------------------
# Sinusoidal table (same math as the torch buffer; stored 2-D, torch stores (max_len,1,D))
# --------------------------------------------------------------------------------------
def make_positional_encoding_table(max_len: int, d_model: int) -> jnp.ndarray:
    position = jnp.arange(max_len, dtype=jnp.float32)[:, None]                   # (max_len, 1)
    div_term = jnp.exp(jnp.arange(0, d_model, 2, dtype=jnp.float32)
                       * (-math.log(10000.0) / d_model))                          # (d_model/2,)
    pe = jnp.zeros((max_len, d_model), dtype=jnp.float32)
    pe = pe.at[:, 0::2].set(jnp.sin(position * div_term))
    pe = pe.at[:, 1::2].set(jnp.cos(position * div_term))
    return pe                                                                      # (max_len, d_model)


# --------------------------------------------------------------------------------------
# Counter-based hash PRNG (int32 only -> lowers everywhere, no TPU-specific primitives)
# --------------------------------------------------------------------------------------
def _i32(v):
    """Reinterpret a 32-bit pattern as a signed int32 Python int."""
    v &= 0xFFFFFFFF
    return v - (1 << 32) if v >= (1 << 31) else v


_H0 = _i32(0x9E3779B9)   # golden-ratio constant
_H1 = _i32(0x85EBCA6B)   # murmur3 fmix32 constants
_H2 = _i32(0xC2B2AE35)


def _lsr(x, n):
    """Logical right shift of int32 values (arithmetic shift + top-bit mask)."""
    return (x >> n) & ((1 << (32 - n)) - 1)


def _uniform31(idx, seed):
    """Uniform int32 in [0, 2**31) per (element index, seed). Pure int32 VPU ops."""
    h = idx ^ (seed * jnp.int32(_H0))
    h = (h ^ _lsr(h, 16)) * jnp.int32(_H1)
    h = (h ^ _lsr(h, 13)) * jnp.int32(_H2)
    h = h ^ _lsr(h, 16)
    return _lsr(h, 1)


def _dropout(y, idx, seed, p, out_dtype):
    thr = jnp.int32(min(int(round(p * 2147483648.0)), 2147483647))   # drop iff u < p * 2^31
    keep = _uniform31(idx, seed) >= thr
    scale = jnp.float32(1.0 / (1.0 - p))                             # scale in f32, cast once
    return jnp.where(keep, y.astype(jnp.float32) * scale, 0.0).astype(out_dtype)


# --------------------------------------------------------------------------------------
# Kernels
# --------------------------------------------------------------------------------------
def _pe_add_kernel_lanes(x_ref, pe_ref, o_ref, *, batch):
    # x_ref/o_ref: (ts, batch*D) dense;  pe_ref: (ts, D) tiled over batch along lanes.
    pe = pe_ref[...]
    if batch > 1:
        pe = jnp.concatenate([pe] * batch, axis=-1)
    o_ref[...] = x_ref[...] + pe


def _pe_add_kernel_3d(x_ref, pe_ref, o_ref):
    # x_ref/o_ref: (ts, B, D) with B a multiple of the sublane pack;  pe_ref: (ts, D).
    o_ref[...] = x_ref[...] + pe_ref[...][:, None, :]


def _pe_add_dropout_kernel_lanes(seed_ref, x_ref, pe_ref, o_ref, *, p, batch):
    rows, cols = x_ref.shape
    pe = pe_ref[...]
    if batch > 1:
        pe = jnp.concatenate([pe] * batch, axis=-1)
    y = x_ref[...] + pe
    r = jax.lax.broadcasted_iota(jnp.int32, (rows, cols), 0) + pl.program_id(0) * rows
    c = jax.lax.broadcasted_iota(jnp.int32, (rows, cols), 1)
    idx = r * cols + c                                   # globally unique element counter
    o_ref[...] = _dropout(y, idx, seed_ref[0], p, o_ref.dtype)


def _pe_add_dropout_kernel_3d(seed_ref, x_ref, pe_ref, o_ref, *, p):
    ts, B, D = x_ref.shape
    y = x_ref[...] + pe_ref[...][:, None, :]
    s = jax.lax.broadcasted_iota(jnp.int32, (ts, B, D), 0) + pl.program_id(0) * ts
    b = jax.lax.broadcasted_iota(jnp.int32, (ts, B, D), 1)
    d = jax.lax.broadcasted_iota(jnp.int32, (ts, B, D), 2)
    idx = (s * B + b) * D + d
    o_ref[...] = _dropout(y, idx, seed_ref[0], p, o_ref.dtype)


# --------------------------------------------------------------------------------------
# Tile sizing (padding-aware) and wrapper
# --------------------------------------------------------------------------------------
def _round_up(v, m):
    return (v + m - 1) // m * m


def _sublane_rows(dtype):
    # rows packed per sublane tile: 8 (f32), 16 (bf16), 32 (int8/fp8)
    return max(8, (8 * 4) // jnp.dtype(dtype).itemsize)


def _choose_tile_s(S, B, D, dtype, *, lane_collapsed,
                   target_bytes=4 * 1024 * 1024, vmem_limit=_VMEM_LIMIT_BYTES):
    itemsize = jnp.dtype(dtype).itemsize
    sub = _sublane_rows(dtype)
    d_pad = _round_up(D, 128)
    if lane_collapsed:
        x_row = _round_up(B * D, 128) * itemsize           # dense (rows, B*D) slab
    else:
        x_row = _round_up(B, sub) * d_pad * itemsize       # padded (B, D) slab per seq row
    pe_row = d_pad * itemsize
    ts = max(1, target_bytes // x_row)                     # ~target_bytes per x tile
    per_s = 2 * (2 * x_row + pe_row)                       # double-buffered x + out + pe
    ts = min(ts, max(1, int(vmem_limit * 0.7) // per_s))   # leave Mosaic scratch headroom
    ts = min(ts, S)
    if S > 8:
        # keep >= 2 grid steps so both v7x TensorCores get work
        ts = min(ts, _round_up(-(-S // 2), 8))
    if ts > 8:
        ts -= ts % 8
    return max(1, int(ts))


def positional_encoding_forward(x, pe_table, *, p: float = 0.1, train: bool = False,
                                seed: int = 0, tile_s: int | None = None,
                                donate_x: bool = False):
    """dropout(x + pe[:seq_len]) for x: (seq_len, batch, d_model).

    pe_table: (max_len, d_model) or (max_len, 1, d_model) sinusoidal table.
    donate_x=True aliases x's buffer to the output (only if the caller no longer needs x).
    """
    S, B, D = x.shape
    pe2d = pe_table.reshape(pe_table.shape[0], D) if pe_table.ndim == 3 else pe_table
    max_len = pe2d.shape[0]
    assert S <= max_len, "sequence longer than positional-encoding table"
    assert pe2d.shape[-1] == D

    dropout = bool(train) and p > 0.0
    if dropout and p >= 1.0:
        return jnp.zeros_like(x)

    sub = _sublane_rows(x.dtype)
    lane_collapsed = (B % sub != 0) and (B <= 32)          # small/odd batch -> dense 2-D layout

    if tile_s is None:
        ts = _choose_tile_s(S, B, D, x.dtype, lane_collapsed=lane_collapsed)
    else:
        ts = int(max(1, min(tile_s, S)))
    if ts % 8 != 0 and ts != S:                            # keep (8, .)-divisible blocks
        ts = S if S < 8 else max(8, (ts // 8) * 8)
    grid = (pl.cdiv(S, ts),)

    # pe: feed the full 2-D table straight to the BlockSpec (no per-call cast/copy of
    # max_len rows); slice/cast only the S used rows when unavoidable.
    if pe2d.dtype != x.dtype:
        pe_in = pe2d[:S].astype(x.dtype)
    elif ts % 8 != 0:                                      # ts == S < 8: block must equal full dim
        pe_in = pe2d[:S]
    else:
        pe_in = pe2d

    cparams = pltpu.CompilerParams(
        dimension_semantics=("parallel",),                 # seq grid shards across TCs (v7x)
        vmem_limit_bytes=_VMEM_LIMIT_BYTES,
    )
    pe_spec = pl.BlockSpec((ts, D), lambda i, *_: (i, 0))

    if lane_collapsed:
        xin = x.reshape(S, B * D)                          # free view: rows dense, lanes = B*D
        x_spec = pl.BlockSpec((ts, B * D), lambda i, *_: (i, 0))
        out_shape = jax.ShapeDtypeStruct((S, B * D), x.dtype)
        kern_eval = functools.partial(_pe_add_kernel_lanes, batch=B)
        kern_drop = functools.partial(_pe_add_dropout_kernel_lanes, p=float(p), batch=B)
    else:
        xin = x
        x_spec = pl.BlockSpec((ts, B, D), lambda i, *_: (i, 0, 0))
        out_shape = jax.ShapeDtypeStruct((S, B, D), x.dtype)
        kern_eval = _pe_add_kernel_3d
        kern_drop = functools.partial(_pe_add_dropout_kernel_3d, p=float(p))

    if dropout:
        out = pl.pallas_call(
            kern_drop,
            out_shape=out_shape,
            grid_spec=pltpu.PrefetchScalarGridSpec(
                num_scalar_prefetch=1,                     # seed lands in SMEM
                grid=grid,
                in_specs=[x_spec, pe_spec],
                out_specs=x_spec,
            ),
            compiler_params=cparams,
            input_output_aliases=({1: 0} if donate_x else {}),
        )(jnp.asarray([seed], dtype=jnp.int32), xin, pe_in)
    else:
        out = pl.pallas_call(
            kern_eval,
            out_shape=out_shape,
            grid=grid,
            in_specs=[x_spec, pe_spec],
            out_specs=x_spec,
            compiler_params=cparams,
            input_output_aliases=({0: 0} if donate_x else {}),
        )(xin, pe_in)

    return out.reshape(S, B, D) if lane_collapsed else out


# --------------------------------------------------------------------------------------
# Demo / self-test
# --------------------------------------------------------------------------------------
if __name__ == "__main__":
    d_model, max_len = 128, 5000
    pe_table = make_positional_encoding_table(max_len, d_model)
    p = 0.1
    scale = 1.0 / (1.0 - p)

    # --- small batch (lane-collapsed dense 2-D path): seq=64, batch=2 ---
    S, B = 64, 2
    x = jax.random.normal(jax.random.PRNGKey(0), (S, B, d_model), dtype=jnp.float32)
    ref = x + pe_table[:S][:, None, :]

    out = jax.block_until_ready(positional_encoding_forward(x, pe_table, p=p, train=False))
    assert out.shape == (S, B, d_model)
    assert jnp.allclose(out, ref, atol=1e-5, rtol=1e-5)

    out_tr = jax.block_until_ready(
        positional_encoding_forward(x, pe_table, p=p, train=True, seed=123))
    # every element is either dropped (0) or kept-and-scaled ((x+pe)/(1-p))
    err = jnp.minimum(jnp.abs(out_tr), jnp.abs(out_tr - ref * scale))
    assert bool(jnp.all(err <= 1e-4 * (1.0 + jnp.abs(ref))))
    drop_frac = float(jnp.mean((out_tr == 0.0).astype(jnp.float32)))
    assert 0.02 < drop_frac < 0.25, drop_frac

    # --- sublane-aligned batch (3-D path): seq=16, batch=8 ---
    S2, B2 = 16, 8
    x2 = jax.random.normal(jax.random.PRNGKey(1), (S2, B2, d_model), dtype=jnp.float32)
    ref2 = x2 + pe_table[:S2][:, None, :]

    out2 = jax.block_until_ready(positional_encoding_forward(x2, pe_table, p=p, train=False))
    assert jnp.allclose(out2, ref2, atol=1e-5, rtol=1e-5)

    out2_tr = jax.block_until_ready(
        positional_encoding_forward(x2, pe_table, p=p, train=True, seed=7))
    err2 = jnp.minimum(jnp.abs(out2_tr), jnp.abs(out2_tr - ref2 * scale))
    assert bool(jnp.all(err2 <= 1e-4 * (1.0 + jnp.abs(ref2))))

    print("KERNEL_OK")
</pallas_src>

<mosaic_0001>
module attributes {stable_mosaic.version = 11 : i64} {
  func.func @_pe_add_kernel_lanes(%arg0: i32, %arg1: memref<32x256xf32, #tpu.memory_space<vmem>>, %arg2: memref<32x128xf32, #tpu.memory_space<vmem>>, %arg3: memref<32x256xf32, #tpu.memory_space<vmem>>) attributes {dimension_semantics = [#tpu.dimension_semantics<parallel>], iteration_bounds = array<i64: 2>, scalar_prefetch = 0 : i64, scratch_operands = 0 : i64, tpu.core_type = #tpu.core_type<tc>, window_params = [{transform_indices = @transform_0, window_bounds = array<i64: 32, 256>}, {transform_indices = @transform_1, window_bounds = array<i64: 32, 128>}, {transform_indices = @transform_2, window_bounds = array<i64: 32, 256>}]} {
    %c0 = arith.constant 0 : index
    %c0_0 = arith.constant 0 : index
    %0 = vector.load %arg2[%c0, %c0_0] : memref<32x128xf32, #tpu.memory_space<vmem>>, vector<32x128xf32>
    %1 = tpu.concatenate %0, %0 in 1 : vector<32x128xf32>, vector<32x128xf32> -> vector<32x256xf32>
    %c0_1 = arith.constant 0 : index
    %c0_2 = arith.constant 0 : index
    %2 = vector.load %arg1[%c0_1, %c0_2] : memref<32x256xf32, #tpu.memory_space<vmem>>, vector<32x256xf32>
    %3 = arith.addf %2, %1 : vector<32x256xf32>
    %c0_3 = arith.constant 0 : index
    %c0_4 = arith.constant 0 : index
    %4 = vector.load %arg3[%c0_3, %c0_4] : memref<32x256xf32, #tpu.memory_space<vmem>>, vector<32x256xf32>
    tpu.vector_store %arg3[%c0_3, %c0_4], %3 {strides = array<i32>} : memref<32x256xf32, #tpu.memory_space<vmem>>, vector<32x256xf32>,
    return
  }
  func.func @transform_0(%arg0: i32) -> (i32, i32) {
    %c0_i32 = arith.constant 0 : i32
    %c0_i32_0 = arith.constant 0 : i32
    return %arg0, %c0_i32 : i32, i32
  }
  func.func @transform_1(%arg0: i32) -> (i32, i32) {
    %c0_i32 = arith.constant 0 : i32
    %c0_i32_0 = arith.constant 0 : i32
    return %arg0, %c0_i32 : i32, i32
  }
  func.func @transform_2(%arg0: i32) -> (i32, i32) {
    %c0_i32 = arith.constant 0 : i32
    %c0_i32_0 = arith.constant 0 : i32
    return %arg0, %c0_i32 : i32, i32
  }
}

</mosaic_0001>

<bundles_post_ra>
// kernel: tpu_custom_call.1
= control target key start
LH: loop header
LB: loop body
LE: loop exit
PB: predicated region body
PF: predicated region fallthrough
CT: control target
= control target key end

     0   :  { %7 = vsyncpa [#allocation3], 0  ;;  %s792_s0 = inlined_call_operand.hbm [shape: f32[64,256], index: 0, kind: input, shape index: {}]   ;;  %s793_s1 = inlined_call_operand.hbm [shape: f32[5000,128], index: 1, kind: input, shape index: {}]   ;;  %s794_s2 = inlined_call_operand.hbm [shape: f32[64,256], index: 2, kind: output, shape index: {}]  }
   0x1   :  { %9 = vsyncpa [#allocation3 + $0x1], 0 }
   0x2   :  { %10 = vsyncpa [#allocation6], 0 }
   0x3   :  { %12 = vsyncpa [#allocation6 + $0x1], 0 }
   0x4   :  { %13 = vsyncpa [#allocation4], 0 }
   0x5   :  { %15 = vsyncpa [#allocation4 + $0x1], 0  ;;  %s578_s9 = smov 0   ;;  %s580_s10 = smov 0  }
   0x6   :  { %s582_s11 = smov 0   ;;  %s584_s12 = smov 0  }
   0x7 LB: > { %s599_s13 = sadd.s32 4294967295, %s552_s12   ;;  %s355_s14 = sadd.s32 4294967294, %s552_s12   ;;  %s552_s12 = sphi %s584_s12, %s807_s12   ;;  %s548_s11 = sphi %s582_s11, %s806_s11   ;;  %s544_s10 = sphi %s580_s10, %s805_s10   ;;  %s540_s9 = sphi %s578_s9, %s804_s9  }
   0x8   : > { %s603_s15 = sadd.s32 1, %s552_s12   ;;  %s28_s16 = sadd.s32 1, %s548_s11 }
   0x9   : > { %s25_s17 = ssub.s32 %s552_s12, %s603_s15  ;;  %p35_p0 = scmp.ne.s32.totalorder %s548_s11, %s544_s10 }
   0xa   : > { %p26_p1 = scmp.eq.s32.totalorder %s25_s17, 0  ;;  %p36_p2 = scmp.eq.s32.totalorder %s552_s12, 0 }
   0xb   : > { %p41_p3 = scmp.ne.s32.totalorder %s544_s10, %s540_s9  ;;  %p42_p4 = scmp.eq.s32.totalorder %s599_s13, 0 }
   0xc   : > { %s615_s18 = scalar_select %p26_p1, %s548_s11, %s28_s16  }
   0xd   : > { %p617_p5 = por %p36_p2, %p35_p0  ;;  %p621_p6 = por %p42_p4, %p41_p3 }
   0xe   : > { %p91_p7 = scmp.eq.s32.totalorder %s599_s13, 1  ;;  %p97_p8 = scmp.eq.s32.totalorder %s355_s14, 1 }
   0xf   : > { %p795_p11 = scmp.ge.s32.totalorder %s552_s12, 2 }
  0x10   : > { %p626_p9 = por %p91_p7, %p35_p0  ;;  %p630_p10 = por %p97_p8, %p41_p3 }
  0x11   : > { %113 = sbr.rel (%p795_p11) target bundleno = 77 (0x4d), region = 16  ;;  %s638_s23 = sand.u32 (!%p795_p11), 1, %s548_s11  }
  0x12   : > { %s799_s21 = scalar_select %p626_p9, 1, 0 }
  0x13   : > { %s800_s22 = scalar_select %p630_p10, 1, 0 }
  0x14   : > { %s380_s24 = sshll.u32 (!%p795_p11), %s552_s12, 10  ;;  %s358_s25 = sshll.u32 (!%p795_p11), %s638_s23, 6 }
  0x15   : > { %s645_s28 = scalar_lea.hbm (!%p795_p11), %s792_s0, %s380_s24  ;;  %s121_s29 = scalar_lea.vmem (!%p795_p11), [#allocation2], %s358_s25 }
  0x16   : > { %s129_s30 = sshll.u32 %s121_s29, 4  ;;  %s118_s3 = scalar_lea.sflag [#allocation3], %s638_s23  ;;  %s647_s30 = int_to_ptr.vmem [resolvable:$true] %s129_s30 }
  0x17   : > { %s432_s4 = scalar_lea.hbm %s645_s28, 1024  ;;  %s436_s7 = scalar_lea.hbm %s792_s0, 2048 }
  0x18   : > { %p433_p12 = scmp.ne.s32.totalorder %s645_s28, %s432_s4  ;;  %p437_p1 = scmp.lt.s32.totalorder %s645_s28, %s792_s0 }
  0x19   : > { %p438_p2 = scmp.lt.s32.totalorder %s436_s7, %s432_s4 }
  0x1a   : > { %p434_p13 = pnand %p433_p12, %p617_p5 }
  0x1b   : > { %p439_p3 = por %p438_p2, %p437_p1 }
  0x1c   : > { %p435_p0 = pneg %p434_p13 }
  0x1e   : > { %p440_p4 = pnand %p439_p3, %p435_p0 }
  0x20   : > { %443 = shalt.err (!%p440_p4)
}
  0x21   : > { %s444_s16 = scalar_lea.vmem %s647_s30, 1024  ;;  %s554_s17 = smov [#allocation2]  }
  0x22   : > { %p445_p7 = scmp.ne.s32.totalorder %s647_s30, %s444_s16  ;;  %s448_s24 = sshll.u32 %s554_s17, 4  ;;  %s449_s24 = int_to_ptr.vmem [resolvable:$false] %s448_s24 }
  0x23   : > { %s450_s25 = scalar_lea.vmem %s449_s24, 2048  ;;  %p451_p13 = scmp.lt.s32.totalorder %s647_s30, %s449_s24 }
  0x24   : > { %p446_p8 = pnand %p445_p7, %p617_p5  ;;  %p452_p11 = scmp.lt.s32.totalorder %s450_s25, %s444_s16 }
  0x26   : > { %p447_p12 = pneg %p446_p8  ;;  %p453_p10 = por %p452_p11, %p451_p13 }
  0x28   : > { %p454_p9 = pnand %p453_p10, %p447_p12 }
  0x2a   : > { %457 = shalt.err (!%p454_p9)
}
  0x2b   : > { %s555_s26 = smov 256   ;;  %s556_s27 = smov 16  }
  0x2c   : > { %384 = dma.hbm_to_vmem [thread:$0]  (%p617_p5), %s645_s28, 1024, %s647_s30, %s118_s3, %s555_s26, %s555_s26, %s556_s27  }
  0x2d   : > { %138 = sbr.rel (!%p617_p5) target bundleno = 77 (0x4d), region = 24  ;;  %s362_s29 = sshll.u32 (%p617_p5), %s638_s23, 5 }
  0x2e   : > { %s363_s4 = sshll.u32 (%p617_p5), %s552_s12, 2  ;;  %s140_s8 = scalar_lea.sflag (%p617_p5), [#allocation6], %s638_s23 }
  0x2f   : > { %s145_s5 = ssub.s32 (%p617_p5), 625, %s363_s4  ;;  %s143_s14 = scalar_lea.vmem (%p617_p5), [#allocation5], %s362_s29 }
  0x30   : > { %p146_p9 = scmp.lt.s32.totalorder (%p617_p5), %s145_s5, 4 }
  0x32   : > { %s809_s5 = smov (!%p146_p9, %s145_s5), 4 }
  0x33   : > { %s676_s6 = sshll.u32 %s809_s5, 7 }
  0x34   : > { %s150_s7 = ssub.s32 512, %s676_s6 }
  0x35   : > { %151 = vsyncadd %s140_s8, %s150_s7  ;;  %p365_p5 = scmp.ne.s32.totalorder %s676_s6, 0  ;;  %s381_s19 = sshll.u32 %s552_s12, 9 }
  0x36   : > { %s687_s3 = scalar_lea.hbm %s793_s1, %s381_s19  ;;  %s156_s16 = sshll.u32 %s143_s14, 4  ;;  %s689_s16 = int_to_ptr.vmem [resolvable:$true] %s156_s16 }
  0x37   : > { %s458_s17 = scalar_lea.hbm %s687_s3, %s676_s6  ;;  %s462_s26 = scalar_lea.hbm %s793_s1, 80000 }
  0x38   : > { %p459_p10 = scmp.ne.s32.totalorder %s687_s3, %s458_s17  ;;  %p463_p1 = scmp.lt.s32.totalorder %s687_s3, %s793_s1 }
  0x39   : > { %p464_p2 = scmp.lt.s32.totalorder %s462_s26, %s458_s17 }
  0x3a   : > { %p460_p11 = pnand %p459_p10, %p365_p5 }
  0x3b   : > { %p465_p3 = por %p464_p2, %p463_p1 }
  0x3c   : > { %p461_p0 = pneg %p460_p11 }
  0x3e   : > { %p466_p4 = pnand %p465_p3, %p461_p0 }
  0x40   : > { %469 = shalt.err (!%p466_p4)
}
  0x41   : > { %s470_s4 = scalar_lea.vmem %s689_s16, %s676_s6  ;;  %s557_s5 = smov [#allocation5]  }
  0x42   : > { %p471_p7 = scmp.ne.s32.totalorder %s689_s16, %s470_s4  ;;  %s474_s7 = sshll.u32 %s557_s5, 4  ;;  %s475_s7 = int_to_ptr.vmem [resolvable:$false] %s474_s7 }
  0x43   : > { %s476_s14 = scalar_lea.vmem %s475_s7, 1024  ;;  %p477_p13 = scmp.lt.s32.totalorder %s689_s16, %s475_s7 }
  0x44   : > { %p472_p8 = pnand %p471_p7, %p365_p5  ;;  %p478_p9 = scmp.lt.s32.totalorder %s476_s14, %s470_s4 }
  0x46   : > { %p473_p12 = pneg %p472_p8  ;;  %p479_p10 = por %p478_p9, %p477_p13 }
  0x48   : > { %p480_p11 = pnand %p479_p10, %p473_p12 }
  0x4a   : > { %483 = shalt.err (!%p480_p11)
}
  0x4b   : > { %s558_s19 = smov 128   ;;  %s559_s28 = smov 8  }
  0x4c   : > { %162 = dma.hbm_to_vmem [thread:$0]  (%p365_p5), %s687_s3, %s676_s6, %s689_s16, %s140_s8, %s558_s19, %s558_s19, %s559_s28  }
  0x4d PF: > { %p369_p0 = scmp.ge.s32.totalorder %s552_s12, 1  ;;  %p164_p1 = scmp.lt.s32.totalorder %s552_s12, 3 }
  0x4f   : > { %p165_p2 = pnand %p369_p0, %p164_p1 }
  0x50   : > { %s719_s30 = sand.u32 (!%p165_p2), 1, %s544_s10  }
  0x51   : > { %168 = sbr.rel (%p165_p2) target bundleno = 116 (0x74), region = 28  ;;  %s370_s17 = sshll.u32 (!%p165_p2), %s719_s30, 6 }
  0x52   : > { %s171_s24 = scalar_lea.sflag (!%p165_p2), [#allocation3], %s719_s30  ;;  %s723_s25 = scalar_lea.vmem (!%p165_p2), [#allocation2], %s370_s17 }
  0x56   : > { %527 = dma.done.wait (%p621_p6), %s171_s24, 1024  }
  0x57   : > { %529 = vsyncadd (%p621_p6), %s171_s24, 4294966272  ;;  %s371_s23 = sshll.u32 %s719_s30, 5  ;;  %s180_s6 = scalar_lea.sflag [#allocation6], %s719_s30 }
  0x58   : > { %s183_s8 = scalar_lea.vmem [#allocation5], %s371_s23 }
  0x59   : > { %531 = dma.done.wait (%p621_p6), %s180_s6, 512  }
  0x5a   : > { %533 = vsyncadd (%p621_p6), %s180_s6, 4294966784  ;;  %v216_v0 = vld [vmem:[%s183_s8] sm:$0xff]  ;;  %s208_s3 = scalar_lea.vmem [#allocation7], %s370_s17  ;;  %v221_v2 = vld [vmem:[%s723_s25 + $0x8] sm:$0xff]  ;;  %s383_s26 = sshll.u32 %s599_s13, 10 }
  0x5b   : > { %v220_v1 = vld [vmem:[%s723_s25] sm:$0xff]  ;;  %s259_s16 = sshll.u32 %s208_s3, 4  ;;  %v229_v4 = vadd.f32 %v221_v2, %v216_v0  ;;  %v217_v5 = vld [vmem:[%s183_s8 + $0x8] sm:$0xff]  ;;  %v222_v6 = vld [vmem:[%s723_s25 + $0x10] sm:$0xff]  ;;  %s749_s27 = scalar_lea.hbm %s794_s2, %s383_s26  ;;  %s742_s16 = int_to_ptr.vmem [resolvable:$true] %s259_s16 }
  0x5c   : > { %v228_v3 = vadd.f32 %v220_v1, %v216_v0  ;;  %v223_v7 = vld [vmem:[%s723_s25 + $0x18] sm:$0xff]  ;;  %v230_v8 = vadd.f32 %v222_v6, %v217_v5  ;;  %v218_v10 = vld [vmem:[%s183_s8 + $0x10] sm:$0xff]  ;;  %v224_v11 = vld [vmem:[%s723_s25 + $0x20] sm:$0xff]  ;;  %s245_s29 = scalar_lea.sflag [#allocation4], %s719_s30  ;;  %s484_s4 = scalar_lea.vmem %s742_s16, 1024 }
  0x5d   : > { %v231_v9 = vadd.f32 %v223_v7, %v217_v5  ;;  %v225_v12 = vld [vmem:[%s723_s25 + $0x28] sm:$0xff]  ;;  %237 = vst [vmem:[%s208_s3 + $0x8] sm:$0xff] %v229_v4  ;;  %v232_v13 = vadd.f32 %v224_v11, %v218_v10  ;;  %v219_v15 = vld [vmem:[%s183_s8 + $0x18] sm:$0xff]  ;;  %v226_v16 = vld [vmem:[%s723_s25 + $0x30] sm:$0xff]  ;;  %p485_p6 = scmp.ne.s32.totalorder %s742_s16, %s484_s4  ;;  %p801_p5 = scmp.ne.s32.totalorder %s799_s21, 0 }
  0x5e   : > { %236 = vst [vmem:[%s208_s3] sm:$0xff] %v228_v3  ;;  %v233_v14 = vadd.f32 %v225_v12, %v218_v10  ;;  %v227_v17 = vld [vmem:[%s723_s25 + $0x38] sm:$0xff]  ;;  %238 = vst [vmem:[%s208_s3 + $0x10] sm:$0xff] %v230_v8  ;;  %v234_v18 = vadd.f32 %v226_v16, %v219_v15  ;;  %s560_s5 = smov [#allocation7]  }
  0x5f   : > { %239 = vst [vmem:[%s208_s3 + $0x18] sm:$0xff] %v231_v9  ;;  %v235_v19 = vadd.f32 %v227_v17, %v219_v15  ;;  %240 = vst [vmem:[%s208_s3 + $0x20] sm:$0xff] %v232_v13  ;;  %p486_p3 = pnand %p485_p6, %p801_p5  ;;  %s488_s7 = sshll.u32 %s560_s5, 4  ;;  %s489_s7 = int_to_ptr.vmem [resolvable:$false] %s488_s7 }
  0x60   : > { %241 = vst [vmem:[%s208_s3 + $0x28] sm:$0xff] %v233_v14  ;;  %242 = vst [vmem:[%s208_s3 + $0x30] sm:$0xff] %v234_v18  ;;  %s490_s14 = scalar_lea.vmem %s489_s7, 2048  ;;  %p491_p7 = scmp.lt.s32.totalorder %s742_s16, %s489_s7 }
  0x61   : > { %243 = vst [vmem:[%s208_s3 + $0x38] sm:$0xff] %v235_v19  ;;  %p487_p4 = pneg %p486_p3  ;;  %p492_p8 = scmp.lt.s32.totalorder %s490_s14, %s484_s4 }
  0x63   : > { %p493_p12 = por %p492_p8, %p491_p7 }
  0x65   : > { %p494_p13 = pnand %p493_p12, %p487_p4 }
  0x67   : > { %497 = shalt.err (!%p494_p13)
}
  0x68   : > { %s498_s19 = scalar_lea.hbm %s749_s27, 1024  ;;  %s502_s24 = scalar_lea.hbm %s794_s2, 2048 }
  0x69   : > { %p499_p9 = scmp.ne.s32.totalorder %s749_s27, %s498_s19  ;;  %p503_p0 = scmp.lt.s32.totalorder %s749_s27, %s794_s2 }
  0x6a   : > { %p504_p1 = scmp.lt.s32.totalorder %s502_s24, %s498_s19 }
  0x6b   : > { %p500_p10 = pnand %p499_p9, %p801_p5 }
  0x6c   : > { %p505_p2 = por %p504_p1, %p503_p0 }
  0x6d   : > { %p501_p11 = pneg %p500_p10 }
  0x6f   : > { %p506_p6 = pnand %p505_p2, %p501_p11 }
  0x71   : > { %509 = shalt.err (!%p506_p6)
}
  0x72   : > { %s561_s6 = smov 256   ;;  %s562_s8 = smov 16  }
  0x73   : > { %387 = dma.vmem_to_hbm [thread:$0]  (%p801_p5), %s742_s16, 1024, %s749_s27, %s245_s29, %s561_s6, %s561_s6, %s562_s8  }
  0x74 PF: > { %s274_s3 = sand.u32 1, %s540_s9   ;;  %p802_p3 = scmp.ne.s32.totalorder %s800_s22, 0 }
  0x75   : > { %p803_p4 = scmp.ge.s32.totalorder %s552_s12, 2  ;;  %s275_s26 = scalar_lea.sflag [#allocation4], %s274_s3 }
  0x77   : > { %p390_p7 = pnand %p803_p4, %p802_p3 }
  0x79   : > { %p391_p8 = pneg %p390_p7 }
  0x7b   : > { %535 = dma.done.wait (%p391_p8), %s275_s26, 1024  }
  0x7c   : > { %537 = vsyncadd (%p391_p8), %s275_s26, 4294966272  ;;  %p18_p12 = scmp.ge.s32.totalorder %s603_s15, 4   ;;  %s804_s9 = smov %s544_s10 }
  0x7d   : > { %s805_s10 = smov %s548_s11  ;;  %s806_s11 = smov %s615_s18 }
  0x7e   : > { %s807_s12 = smov %s603_s15  ;;  %20 = sbr.rel (!%p18_p12) target bundleno = 7 (0x7), region = 86 }
  0x83   :  { %280 = vsyncpa [#allocation3], 1 }
  0x84   :  { %282 = vsyncpa [#allocation3 + $0x1], 1 }
  0x85   :  { %283 = vsyncpa [#allocation6], 1 }
  0x86   :  { %285 = vsyncpa [#allocation6 + $0x1], 1 }
  0x87   :  { %286 = vsyncpa [#allocation4], 1 }
  0x88   :  { %288 = vsyncpa [#allocation4 + $0x1], 1 }

</bundles_post_ra>
